<compile_context>
chip_gen: v6e
topology: v6e:2x2x1
jax: 0.10.0
libtpu: 0.0.40
codegen_flags: <defaults>
</compile_context>

<pallas_src>
import functools

import jax
import jax.numpy as jnp
from jax import lax
from jax.experimental import pallas as pl
from jax.experimental.pallas import tpu as pltpu


def _round_up(x, m):
    return (x + m - 1) // m * m


def _actor_kernel(state_ref, w1_ref, w2_ref, whead_ref, bias_ref, out_ref, *,
                  hidden_dim, action_dim):
    H = hidden_dim
    A = action_dim

    x = state_ref[...]                                             # [TB, S]
    b = bias_ref[...]                                              # [1, 2H+2A]
    b1 = b[:, :H]
    b2 = b[:, H:2 * H]
    bh = b[:, 2 * H:]

    # fc1 + relu
    h = jnp.dot(x, w1_ref[...], preferred_element_type=jnp.float32) + b1
    h = jnp.maximum(h, 0.0)                                        # [TB, H]

    # fc2 + relu
    h = jnp.dot(h, w2_ref[...], preferred_element_type=jnp.float32) + b2
    h = jnp.maximum(h, 0.0)                                        # [TB, H]

    # fused heads: lanes [0:A] = mu, lanes [A:2A] = log_std
    heads = jnp.dot(h, whead_ref[...], preferred_element_type=jnp.float32) + bh

    # std branch: clamp(-20, 2) -> exp ; select per lane (no cross-lane
    # slicing/concat needed: VPU select + EUP exp).
    lane = lax.broadcasted_iota(jnp.int32, heads.shape, dimension=1)
    is_std = lane >= A
    std_branch = jnp.exp(jnp.clip(heads, -20.0, 2.0))
    out_ref[...] = jnp.where(is_std, std_branch, heads).astype(out_ref.dtype)


def actor_forward(state, packed, *, tb=128):
    """Pallas implementation of Actor.forward: returns (mu, std).

    `packed` comes from pack_actor_params(); state is [B, state_dim] f32.
    """
    B, S = state.shape
    H = packed["w1"].shape[1]
    A2 = packed["whead"].shape[1]
    A = A2 // 2

    # Batch tile: 128 rows when the batch is big enough, otherwise the batch
    # rounded up to the 8-sublane granule.  Pad the batch to a tile multiple.
    TB = tb if B >= tb else _round_up(B, 8)
    B_pad = _round_up(B, TB)
    if B_pad != B:
        state = jnp.pad(state, ((0, B_pad - B), (0, 0)))
    nb = B_pad // TB

    kernel = functools.partial(_actor_kernel, hidden_dim=H, action_dim=A)

    out = pl.pallas_call(
        kernel,
        out_shape=jax.ShapeDtypeStruct((B_pad, A2), jnp.float32),
        grid=(nb,),
        in_specs=[
            pl.BlockSpec((TB, S), lambda i: (i, 0)),          # state tile
            pl.BlockSpec((S, H), lambda i: (0, 0)),           # w1 (resident)
            pl.BlockSpec((H, H), lambda i: (0, 0)),           # w2 (resident)
            pl.BlockSpec((H, A2), lambda i: (0, 0)),          # fused head W
            pl.BlockSpec((1, 2 * H + A2), lambda i: (0, 0)),  # packed biases
        ],
        out_specs=pl.BlockSpec((TB, A2), lambda i: (i, 0)),
        compiler_params=pltpu.CompilerParams(
            dimension_semantics=("parallel",)),  # v7x: split tiles across TCs
    )(state, packed["w1"], packed["w2"], packed["whead"], packed["bias"])

    out = out[:B]
    return out[:, :A], out[:, A:]


def init_actor_params(key, state_dim, action_dim, hidden_dim):
    """Deterministic init mirroring nn.Linear default (uniform ±1/sqrt(fan_in)).

    Weights are stored as [in, out] (transposed vs. PyTorch's [out, in]);
    biases as [1, out].
    """
    def linear(k, fan_in, fan_out):
        kw, kb = jax.random.split(k)
        bound = 1.0 / jnp.sqrt(float(fan_in))
        w = jax.random.uniform(kw, (fan_in, fan_out), jnp.float32, -bound, bound)
        b = jax.random.uniform(kb, (1, fan_out), jnp.float32, -bound, bound)
        return w, b

    k1, k2, k3, k4 = jax.random.split(key, 4)
    w1, b1 = linear(k1, state_dim, hidden_dim)
    w2, b2 = linear(k2, hidden_dim, hidden_dim)
    wmu, bmu = linear(k3, hidden_dim, action_dim)
    wls, bls = linear(k4, hidden_dim, action_dim)
    return {"w1": w1, "b1": b1, "w2": w2, "b2": b2,
            "wmu": wmu, "bmu": bmu, "wls": wls, "bls": bls}


def pack_actor_params(p):
    """Fuse the two heads and pack all biases (done once, outside the kernel)."""
    whead = jnp.concatenate([p["wmu"], p["wls"]], axis=1)                 # [H, 2A]
    bias = jnp.concatenate([p["b1"], p["b2"], p["bmu"], p["bls"]], axis=1)  # [1, 2H+2A]
    return {"w1": p["w1"], "w2": p["w2"], "whead": whead, "bias": bias}


def actor_forward_ref(state, params):
    """Plain-JAX reference for correctness checking."""
    h = jnp.maximum(state @ params["w1"] + params["b1"], 0.0)
    h = jnp.maximum(h @ params["w2"] + params["b2"], 0.0)
    mu = h @ params["wmu"] + params["bmu"]
    log_std = jnp.clip(h @ params["wls"] + params["bls"], -20.0, 2.0)
    return mu, jnp.exp(log_std)


if __name__ == "__main__":
    # TODO(synk): Actor.sample() uses rsample (reparameterized Normal draw) +
    # tanh log-prob correction, which needs RNG plumbing; only forward() is
    # implemented here.
    state_dim, action_dim, hidden_dim = 16, 8, 32
    batch = 256  # fill MXU rows / amortize launch overhead (2 tiles of 128)

    key = jax.random.PRNGKey(0)
    kp, kx = jax.random.split(key)
    params = init_actor_params(kp, state_dim, action_dim, hidden_dim)
    packed = pack_actor_params(params)
    state = jax.random.normal(kx, (batch, state_dim), dtype=jnp.float32)

    mu, std = actor_forward(state, packed)
    jax.block_until_ready((mu, std))

    mu_ref, std_ref = actor_forward_ref(state, params)
    assert mu.shape == (batch, action_dim) and std.shape == (batch, action_dim)
    assert jnp.allclose(mu, mu_ref, atol=1e-5, rtol=1e-5)
    assert jnp.allclose(std, std_ref, atol=1e-5, rtol=1e-5)
    assert bool(jnp.all(std > 0.0))

    # Also exercise the small-batch (sub-tile, padded) path.
    mu_s, std_s = actor_forward(state[:8], packed)
    jax.block_until_ready((mu_s, std_s))
    assert jnp.allclose(mu_s, mu_ref[:8], atol=1e-5, rtol=1e-5)
    assert jnp.allclose(std_s, std_ref[:8], atol=1e-5, rtol=1e-5)

    print("KERNEL_OK")
</pallas_src>

<mosaic_0001>
module attributes {stable_mosaic.version = 11 : i64} {
  func.func @_actor_kernel(%arg0: i32, %arg1: memref<128x16xf32, #tpu.memory_space<vmem>>, %arg2: memref<16x32xf32, #tpu.memory_space<vmem>>, %arg3: memref<32x32xf32, #tpu.memory_space<vmem>>, %arg4: memref<32x16xf32, #tpu.memory_space<vmem>>, %arg5: memref<1x80xf32, #tpu.memory_space<vmem>>, %arg6: memref<128x16xf32, #tpu.memory_space<vmem>>) attributes {dimension_semantics = [#tpu.dimension_semantics<parallel>], iteration_bounds = array<i64: 2>, scalar_prefetch = 0 : i64, scratch_operands = 0 : i64, tpu.core_type = #tpu.core_type<tc>, window_params = [{transform_indices = @transform_0, window_bounds = array<i64: 128, 16>}, {pipeline_mode = #tpu.pipeline_mode<synchronous>, transform_indices = @transform_1, window_bounds = array<i64: 16, 32>}, {pipeline_mode = #tpu.pipeline_mode<synchronous>, transform_indices = @transform_2, window_bounds = array<i64: 32, 32>}, {pipeline_mode = #tpu.pipeline_mode<synchronous>, transform_indices = @transform_3, window_bounds = array<i64: 32, 16>}, {pipeline_mode = #tpu.pipeline_mode<synchronous>, transform_indices = @transform_4, window_bounds = array<i64: 1, 80>}, {transform_indices = @transform_5, window_bounds = array<i64: 128, 16>}]} {
    %c0 = arith.constant 0 : index
    %c0_0 = arith.constant 0 : index
    %0 = vector.load %arg1[%c0, %c0_0] : memref<128x16xf32, #tpu.memory_space<vmem>>, vector<128x16xf32>
    %c0_1 = arith.constant 0 : index
    %c0_2 = arith.constant 0 : index
    %1 = vector.load %arg5[%c0_1, %c0_2] : memref<1x80xf32, #tpu.memory_space<vmem>>, vector<1x80xf32>
    %2 = vector.extract_strided_slice %1 {offsets = [0, 0], sizes = [1, 32], strides = [1, 1]} : vector<1x80xf32> to vector<1x32xf32>
    %3 = vector.extract_strided_slice %1 {offsets = [0, 32], sizes = [1, 32], strides = [1, 1]} : vector<1x80xf32> to vector<1x32xf32>
    %4 = vector.extract_strided_slice %1 {offsets = [0, 64], sizes = [1, 16], strides = [1, 1]} : vector<1x80xf32> to vector<1x16xf32>
    %c0_3 = arith.constant 0 : index
    %c0_4 = arith.constant 0 : index
    %5 = vector.load %arg2[%c0_3, %c0_4] : memref<16x32xf32, #tpu.memory_space<vmem>>, vector<16x32xf32>
    %cst = arith.constant dense<0.000000e+00> : vector<128x32xf32>
    %6 = tpu.matmul %0, %5, %cst {dimension_numbers = #tpu.dot_dimension_numbers<[1], [0], [0], [1], [0, 0, 1, 1], [], []>} : vector<128x16xf32>, vector<16x32xf32>, vector<128x32xf32> -> vector<128x32xf32>
    %7 = vector.broadcast %2 : vector<1x32xf32> to vector<128x32xf32>
    %8 = arith.addf %6, %7 : vector<128x32xf32>
    %cst_5 = arith.constant 0.000000e+00 : f32
    %9 = vector.broadcast %cst_5 : f32 to vector<128x32xf32>
    %10 = arith.maximumf %8, %9 : vector<128x32xf32>
    %c0_6 = arith.constant 0 : index
    %c0_7 = arith.constant 0 : index
    %11 = vector.load %arg3[%c0_6, %c0_7] : memref<32x32xf32, #tpu.memory_space<vmem>>, vector<32x32xf32>
    %cst_8 = arith.constant dense<0.000000e+00> : vector<128x32xf32>
    %12 = tpu.matmul %10, %11, %cst_8 {dimension_numbers = #tpu.dot_dimension_numbers<[1], [0], [0], [1], [0, 0, 1, 1], [], []>} : vector<128x32xf32>, vector<32x32xf32>, vector<128x32xf32> -> vector<128x32xf32>
    %13 = vector.broadcast %3 : vector<1x32xf32> to vector<128x32xf32>
    %14 = arith.addf %12, %13 : vector<128x32xf32>
    %cst_9 = arith.constant 0.000000e+00 : f32
    %15 = vector.broadcast %cst_9 : f32 to vector<128x32xf32>
    %16 = arith.maximumf %14, %15 : vector<128x32xf32>
    %c0_10 = arith.constant 0 : index
    %c0_11 = arith.constant 0 : index
    %17 = vector.load %arg4[%c0_10, %c0_11] : memref<32x16xf32, #tpu.memory_space<vmem>>, vector<32x16xf32>
    %cst_12 = arith.constant dense<0.000000e+00> : vector<128x16xf32>
    %18 = tpu.matmul %16, %17, %cst_12 {dimension_numbers = #tpu.dot_dimension_numbers<[1], [0], [0], [1], [0, 0, 1, 1], [], []>} : vector<128x32xf32>, vector<32x16xf32>, vector<128x16xf32> -> vector<128x16xf32>
    %19 = vector.broadcast %4 : vector<1x16xf32> to vector<128x16xf32>
    %20 = arith.addf %18, %19 : vector<128x16xf32>
    %21 = tpu.iota {dimensions = array<i32: 1>} : vector<128x16xi32>
    %c8_i32 = arith.constant 8 : i32
    %22 = vector.broadcast %c8_i32 : i32 to vector<128x16xi32>
    %23 = arith.cmpi sge, %21, %22 : vector<128x16xi32>
    %cst_13 = arith.constant -2.000000e+01 : f32
    %cst_14 = arith.constant 2.000000e+00 : f32
    %24 = vector.broadcast %cst_13 : f32 to vector<128x16xf32>
    %25 = arith.maximumf %24, %20 : vector<128x16xf32>
    %26 = vector.broadcast %cst_14 : f32 to vector<128x16xf32>
    %27 = arith.minimumf %26, %25 : vector<128x16xf32>
    %28 = math.exp %27 : vector<128x16xf32>
    %29 = arith.select %23, %28, %20 : vector<128x16xi1>, vector<128x16xf32>
    %c0_15 = arith.constant 0 : index
    %c0_16 = arith.constant 0 : index
    %30 = vector.load %arg6[%c0_15, %c0_16] : memref<128x16xf32, #tpu.memory_space<vmem>>, vector<128x16xf32>
    tpu.vector_store %arg6[%c0_15, %c0_16], %29 {strides = array<i32>} : memref<128x16xf32, #tpu.memory_space<vmem>>, vector<128x16xf32>,
    return
  }
  func.func @transform_0(%arg0: i32) -> (i32, i32) {
    %c0_i32 = arith.constant 0 : i32
    %c0_i32_0 = arith.constant 0 : i32
    return %arg0, %c0_i32 : i32, i32
  }
  func.func @transform_1(%arg0: i32) -> (i32, i32) {
    %c0_i32 = arith.constant 0 : i32
    %c0_i32_0 = arith.constant 0 : i32
    %c0_i32_1 = arith.constant 0 : i32
    return %c0_i32, %c0_i32_0 : i32, i32
  }
  func.func @transform_2(%arg0: i32) -> (i32, i32) {
    %c0_i32 = arith.constant 0 : i32
    %c0_i32_0 = arith.constant 0 : i32
    %c0_i32_1 = arith.constant 0 : i32
    return %c0_i32, %c0_i32_0 : i32, i32
  }
  func.func @transform_3(%arg0: i32) -> (i32, i32) {
    %c0_i32 = arith.constant 0 : i32
    %c0_i32_0 = arith.constant 0 : i32
    %c0_i32_1 = arith.constant 0 : i32
    return %c0_i32, %c0_i32_0 : i32, i32
  }
  func.func @transform_4(%arg0: i32) -> (i32, i32) {
    %c0_i32 = arith.constant 0 : i32
    %c0_i32_0 = arith.constant 0 : i32
    %c0_i32_1 = arith.constant 0 : i32
    return %c0_i32, %c0_i32_0 : i32, i32
  }
  func.func @transform_5(%arg0: i32) -> (i32, i32) {
    %c0_i32 = arith.constant 0 : i32
    %c0_i32_0 = arith.constant 0 : i32
    return %arg0, %c0_i32 : i32, i32
  }
}

</mosaic_0001>

<bundles_post_ra>
// kernel: tpu_custom_call.1
= control target key start
LH: loop header
LB: loop body
LE: loop exit
PB: predicated region body
PF: predicated region fallthrough
CT: control target
= control target key end

     0   :  { %s1331_s18 = smov 0   ;;  %s1609_s0 = inlined_call_operand.vmem [shape: f32[256,16], index: 0, kind: input, shape index: {}]   ;;  %s1610_s1 = inlined_call_operand.vmem [shape: f32[16,32], index: 1, kind: input, shape index: {}]   ;;  %s1611_s2 = inlined_call_operand.vmem [shape: f32[32,32], index: 2, kind: input, shape index: {}]   ;;  %s1612_s3 = inlined_call_operand.vmem [shape: f32[32,16], index: 3, kind: input, shape index: {}]   ;;  %s1613_s4 = inlined_call_operand.vmem [shape: f32[1,80], index: 4, kind: input, shape index: {}]   ;;  %s1614_s5 = inlined_call_operand.vmem [shape: f32[256,16], index: 5, kind: output, shape index: {}]  }
   0x1 LB: > { %s1035_s19 = sadd.s32 4294967295, %s1297_s18   ;;  %p1039_p0 = scmp.ge.s32.totalorder %s1297_s18, 1  ;;  %s1297_s18 = sphi %s1331_s18, %s15_s18  }
   0x2   : > { %p188_p1 = scmp.lt.s32.totalorder %s1297_s18, 3 }
   0x4   : > { %p189_p2 = pnand %p1039_p0, %p188_p1 }
   0x5   : > { %s1040_s24 = sshll.u32 (!%p189_p2), %s1035_s19, 4  ;;  %s1299_s19 = smov (!%p189_p2), 96  }
   0x6   : > { %192 = sbr.rel (%p189_p2) target bundleno = 664 (0x298), region = 40  ;;  %p217_p3 = scmp.lt.s32.totalorder (!%p189_p2), %s1040_s24, 31 }
   0x7   : > { %s1300_s25 = smov (!%p189_p2), 64  }
   0xb   : > { %v246_v0 = vld [vmem:[%s1610_s1 + $0x8] sm:$0xff]  ;;  %v245_v1 = vld [vmem:[%s1610_s1] sm:$0xff]  ;;  %v466_v2 = vld [vmem:[%s1611_s2 + $0x18] sm:$0xff]  ;;  %s1616_s24 = smov (!%p217_p3, %s1040_s24), 31  ;;  %vm253_vm0 = vcmask 130048   ;;  %vm470_vm1 = vcmask 261120  }
   0xc   : > { %1153 = vmatprep.subr.mxu0 %v246_v0  ;;  %1245 = vmatprep.subr.mxu1 %v246_v0  ;;  %s1041_s27 = sshll.u32 %s1616_s24, 3  ;;  %v465_v7 = vld [vmem:[%s1611_s2 + $0x10] sm:$0xff]  ;;  %v464_v13 = vld [vmem:[%s1611_s2 + $0x8] sm:$0xff]  ;;  %v463_v21 = vld [vmem:[%s1611_s2] sm:$0xff] }
   0xd   : > { %1154 = vmatpush3.msra.mxu0 %v246_v0  ;;  %1247 = vmatpush3.msra.mxu1 %v246_v0  ;;  %s1356_s30 = scalar_lea.vmem %s1609_s0, %s1041_s27  ;;  %v1402_v22 = vld [vmem:[%s1613_s4] ss:$0 sm:$0xff]  ;;  %v683_v23 = vld [vmem:[%s1612_s3 + $0x18] sm:$0xff]  ;;  %v682_v24 = vld [vmem:[%s1612_s3 + $0x10] sm:$0xff]  ;;  %s1512_s29 = scalar_lea.vmem %s1614_s5, %s1041_s27 }
   0xe   : > { %1155 = vmatprep.subr.mxu0 %v245_v1  ;;  %1246 = vmatprep.subr.mxu1 %v245_v1  ;;  %v228_v3 = vld [vmem:[%s1356_s30] sm:$0xff]  ;;  %v229_v4 = vld [vmem:[%s1356_s30 + $0x8] sm:$0xff]  ;;  %v230_v5 = vld [vmem:[%s1356_s30 + $0x10] sm:$0xff] }
   0xf   : > { %1156 = vmatpush3.msra.mxu0 %v245_v1  ;;  %1248 = vmatpush3.msra.mxu1 %v245_v1  ;;  %v236_v6 = vld [vmem:[%s1356_s30 + $0x40] sm:$0xff]  ;;  %v231_v8 = vld [vmem:[%s1356_s30 + $0x18] sm:$0xff]  ;;  %v237_v9 = vld [vmem:[%s1356_s30 + $0x48] sm:$0xff] }
  0x10   : > { %1181 = vmatprep.subr.mxu1 %v466_v2  ;;  %1157 = vmatprep.mubr.msk.f32.mxu0 %vm253_vm0, %v228_v3  ;;  %v238_v10 = vld [vmem:[%s1356_s30 + $0x50] sm:$0xff]  ;;  %v232_v11 = vld [vmem:[%s1356_s30 + $0x20] sm:$0xff]  ;;  %v239_v12 = vld [vmem:[%s1356_s30 + $0x58] sm:$0xff] }
  0x11   : > { %1158 = vmatmul.mubr.msk.f32.vlgmr.msra.gmra.mxu0 %vm253_vm0, %v229_v4  ;;  %1169 = vmatprep.mubr.msk.f32.mxu1 %vm253_vm0, %v236_v6  ;;  %v240_v14 = vld [vmem:[%s1356_s30 + $0x60] sm:$0xff]  ;;  %v233_v15 = vld [vmem:[%s1356_s30 + $0x28] sm:$0xff]  ;;  %v234_v16 = vld [vmem:[%s1356_s30 + $0x30] sm:$0xff] }
  0x12   : > { %1160 = vmatprep.mubr.msk.f32.mxu0 %vm253_vm0, %v230_v5  ;;  %1170 = vmatmul.mubr.msk.f32.vlgmr.msra.gmra.mxu1 %vm253_vm0, %v237_v9  ;;  %v241_v17 = vld [vmem:[%s1356_s30 + $0x68] sm:$0xff]  ;;  %v242_v18 = vld [vmem:[%s1356_s30 + $0x70] sm:$0xff]  ;;  %v235_v19 = vld [vmem:[%s1356_s30 + $0x38] sm:$0xff] }
  0x13   : > { %1172 = vmatprep.mubr.msk.f32.mxu1 %vm253_vm0, %v238_v10  ;;  %1182 = vmatpush3.msra.mxu1 %v466_v2  ;;  %v243_v20 = vld [vmem:[%s1356_s30 + $0x78] sm:$0xff]  ;;  %v681_v25 = vld [vmem:[%s1612_s3 + $0x8] sm:$0xff]  ;;  %v680_v10 = vld [vmem:[%s1612_s3] sm:$0xff] }
  0x14   : > { %1183 = vmatprep.subr.mxu1 %v465_v7  ;;  %467 = vrot.lane.b32.xlu0 %v1402_v22, %s1299_s19 }
  0x15   : > { %1161 = vmatmul.mubr.msk.f32.gmra.mxu0 %vm253_vm0, %v231_v8  ;;  %1184 = vmatpush3.msra.mxu1 %v465_v7 }
  0x16   : > { %1163 = vmatprep.mubr.msk.f32.mxu0 %vm253_vm0, %v232_v11  ;;  %1173 = vmatmul.mubr.msk.f32.gmra.mxu1 %vm253_vm0, %v239_v12 }
  0x17   : > { %1185 = vmatprep.subr.mxu1 %v464_v13  ;;  %1175 = vmatprep.mubr.msk.f32.mxu1 %vm253_vm0, %v240_v14 }
  0x18   : > { %1186 = vmatpush3.msra.mxu1 %v464_v13  ;;  %1213 = vmatprep.subr.mxu0 %v683_v23 }
  0x19   : > { %1164 = vmatmul.mubr.msk.f32.gmra.mxu0 %vm253_vm0, %v233_v15  ;;  %1187 = vmatprep.subr.mxu1 %v463_v21 }
  0x1a   : > { %1166 = vmatprep.mubr.msk.f32.mxu0 %vm253_vm0, %v234_v16  ;;  %1176 = vmatmul.mubr.msk.f32.gmra.mxu1 %vm253_vm0, %v241_v17 }
  0x1b   : > { %1178 = vmatprep.mubr.msk.f32.mxu1 %vm253_vm0, %v242_v18  ;;  %1188 = vmatpush3.msra.mxu1 %v463_v21 }
  0x1c   : > { %1214 = vmatpush3.msra.mxu0 %v683_v23  ;;  %684 = vrot.lane.b32.xlu0 %v1402_v22, %s1300_s25 }
  0x1d   : > { %1167 = vmatmul.mubr.msk.f32.gmra.mxu0 %vm253_vm0, %v235_v19  ;;  %1215 = vmatprep.subr.mxu0 %v682_v24 }
  0x1e   : > { %1179 = vmatmul.mubr.msk.f32.gmra.mxu1 %vm253_vm0, %v243_v20  ;;  %1216 = vmatpush3.msra.mxu0 %v682_v24 }
  0x1f   : > { %1217 = vmatprep.subr.mxu0 %v681_v25 }
  0x20   : > { %1218 = vmatpush3.msra.mxu0 %v681_v25 }
  0x21   : > { %1219 = vmatprep.subr.mxu0 %v680_v10 }
  0x22   : > { %1220 = vmatpush3.msra.mxu0 %v680_v10 }
  0x86   : > { %v468_v11 = vpop.permute.xlu0 %467 }
  0xd1   : > { %v1159_v26 = vpop.f32.mrf.mxu0 }
  0xd2   : > { %v374_v27 = vadd.f32 %v1159_v26, %v1402_v22  ;;  %v1171_v29 = vpop.f32.mrf.mxu1 }
  0xd3   : > { %v368_v28 = vpop.f32.mrf.mxu0  ;;  %v414_v59 = vadd.f32 %v1171_v29, %v1402_v22 }
  0xd4   : > { %v369_v30 = vadd.f32 %v1402_v22, %v368_v28  ;;  %v408_v32 = vpop.f32.mrf.mxu1  ;;  %v448_v34 = vmax.f32 %v374_v27, 0.0 }
  0xd5   : > { %v1162_v31 = vpop.f32.mrf.mxu0  ;;  %v409_v49 = vadd.f32 %v1402_v22, %v408_v32  ;;  %v456_v63 = vmax.f32 %v414_v59, 0.0 }
  0xd6   : > { %v447_v33 = vmax.f32 %v369_v30, 0.0  ;;  %v384_v35 = vadd.f32 %v1162_v31, %v1402_v22  ;;  %v1174_v37 = vpop.f32.mrf.mxu1 }
  0xd7   : > { %v378_v36 = vpop.f32.mrf.mxu0  ;;  %v455_v56 = vmax.f32 %v409_v49, 0.0  ;;  %v424_v0 = vadd.f32 %v1174_v37, %v1402_v22 }
  0xd8   : > { %v379_v38 = vadd.f32 %v1402_v22, %v378_v36  ;;  %1189 = vmatprep.mubr.msk.f32.mxu1 %vm470_vm1, %v447_v33  ;;  %v418_v40 = vpop.f32.mrf.mxu1  ;;  %v450_v42 = vmax.f32 %v384_v35, 0.0 }
  0xd9   : > { %v1165_v39 = vpop.f32.mrf.mxu0  ;;  %1190 = vmatmul.mubr.msk.f32.vlgmr.msra.gmra.mxu1 %vm470_vm1, %v448_v34  ;;  %v419_v57 = vadd.f32 %v1402_v22, %v418_v40  ;;  %v458_v4 = vmax.f32 %v424_v0, 0.0 }
  0xda   : > { %v449_v41 = vmax.f32 %v379_v38, 0.0  ;;  %v394_v43 = vadd.f32 %v1165_v39, %v1402_v22  ;;  %v1177_v45 = vpop.f32.mrf.mxu1 }
  0xdb   : > { %v388_v44 = vpop.f32.mrf.mxu0  ;;  %v457_v61 = vmax.f32 %v419_v57, 0.0  ;;  %v434_v5 = vadd.f32 %v1177_v45, %v1402_v22 }
  0xdc   : > { %v389_v46 = vadd.f32 %v1402_v22, %v388_v44  ;;  %1192 = vmatprep.mubr.msk.f32.mxu1 %vm470_vm1, %v449_v41  ;;  %v452_v50 = vmax.f32 %v394_v43, 0.0  ;;  %v428_v53 = vpop.f32.mrf.mxu1 }
  0xdd   : > { %v1168_v47 = vpop.f32.mrf.mxu0  ;;  %1193 = vmatmul.mubr.msk.f32.gmra.mxu1 %vm470_vm1, %v450_v42  ;;  %v429_v62 = vadd.f32 %v1402_v22, %v428_v53  ;;  %v460_v7 = vmax.f32 %v434_v5, 0.0 }
  0xde   : > { %v451_v48 = vmax.f32 %v389_v46, 0.0  ;;  %v404_v51 = vadd.f32 %v1168_v47, %v1402_v22  ;;  %v1180_v60 = vpop.f32.mrf.mxu1 }
  0xdf   : > { %v398_v52 = vpop.f32.mrf.mxu0  ;;  %v459_v2 = vmax.f32 %v429_v62, 0.0  ;;  %v444_v8 = vadd.f32 %v1180_v60, %v1402_v22  ;;  %v1466_v60 = vpop.permute.xlu0 %684 }
  0xe0   : > { %v399_v54 = vadd.f32 %v1402_v22, %v398_v52  ;;  %1195 = vmatprep.mubr.msk.f32.mxu1 %vm470_vm1, %v451_v48  ;;  %v454_v58 = vmax.f32 %v404_v51, 0.0  ;;  %v438_v1 = vpop.f32.mrf.mxu1 }
  0xe1   : > { %1196 = vmatmul.mubr.msk.f32.gmra.mxu1 %vm470_vm1, %v452_v50  ;;  %v439_v3 = vadd.f32 %v1402_v22, %v438_v1  ;;  %v462_v9 = vmax.f32 %v444_v8, 0.0 }
  0xe2   : > { %v453_v55 = vmax.f32 %v399_v54, 0.0 }
  0xe3   : > { %v461_v6 = vmax.f32 %v439_v3, 0.0 }
  0xe4   : > { %1198 = vmatprep.mubr.msk.f32.mxu1 %vm470_vm1, %v453_v55 }
  0xe5   : > { %1199 = vmatmul.mubr.msk.f32.gmra.mxu1 %vm470_vm1, %v454_v58 }
  0xe6   : > { %1201 = vmatprep.mubr.msk.f32.mxu1 %vm470_vm1, %v455_v56 }
  0xe9   : > { %1202 = vmatmul.mubr.msk.f32.gmra.mxu1 %vm470_vm1, %v456_v63 }
  0xea   : > { %1204 = vmatprep.mubr.msk.f32.mxu1 %vm470_vm1, %v457_v61 }
  0xed   : > { %1205 = vmatmul.mubr.msk.f32.gmra.mxu1 %vm470_vm1, %v458_v4 }
  0xee   : > { %1207 = vmatprep.mubr.msk.f32.mxu1 %vm470_vm1, %v459_v2 }
  0xf1   : > { %1208 = vmatmul.mubr.msk.f32.gmra.mxu1 %vm470_vm1, %v460_v7 }
  0xf2   : > { %1210 = vmatprep.mubr.msk.f32.mxu1 %vm470_vm1, %v461_v6 }
  0xf5   : > { %1211 = vmatmul.mubr.msk.f32.gmra.mxu1 %vm470_vm1, %v462_v9 }
 0x199   : > { %v1191_v12 = vpop.f32.mrf.mxu1 }
 0x19a   : > { %v591_v13 = vadd.f32 %v1191_v12, %v468_v11 }
 0x19b   : > { %v585_v14 = vpop.f32.mrf.mxu1 }
 0x19c   : > { %v586_v15 = vadd.f32 %v585_v14, %v468_v11  ;;  %v665_v18 = vmax.f32 %v591_v13, 0.0 }
 0x19d   : > { %v1194_v16 = vpop.f32.mrf.mxu1 }
 0x19e   : > { %v664_v17 = vmax.f32 %v586_v15, 0.0  ;;  %v601_v19 = vadd.f32 %v1194_v16, %v468_v11 }
 0x19f   : > { %v595_v20 = vpop.f32.mrf.mxu1 }
 0x1a0   : > { %v596_v21 = vadd.f32 %v595_v20, %v468_v11  ;;  %1221 = vmatprep.mubr.msk.f32.mxu0 %vm470_vm1, %v664_v17  ;;  %v667_v25 = vmax.f32 %v601_v19, 0.0  ;;  %v880_v20 = vlaneseq }
 0x1a1   : > { %v1197_v23 = vpop.f32.mrf.mxu1  ;;  %1222 = vmatmul.mubr.msk.f32.vlgmr.msra.gmra.mxu0 %vm470_vm1, %v665_v18 }
 0x1a2   : > { %v666_v24 = vmax.f32 %v596_v21, 0.0  ;;  %v611_v26 = vadd.f32 %v1197_v23, %v468_v11 }
 0x1a3   : > { %v605_v22 = vpop.f32.mrf.mxu1 }
 0x1a4   : > { %v606_v27 = vadd.f32 %v605_v22, %v468_v11  ;;  %1224 = vmatprep.mubr.msk.f32.mxu0 %vm470_vm1, %v666_v24  ;;  %v669_v30 = vmax.f32 %v611_v26, 0.0 }
 0x1a5   : > { %v1200_v28 = vpop.f32.mrf.mxu1  ;;  %1225 = vmatmul.mubr.msk.f32.gmra.mxu0 %vm470_vm1, %v667_v25 }
 0x1a6   : > { %v668_v29 = vmax.f32 %v606_v27, 0.0  ;;  %v621_v31 = vadd.f32 %v1200_v28, %v468_v11 }
 0x1a7   : > { %v615_v32 = vpop.f32.mrf.mxu1 }
 0x1a8   : > { %v616_v33 = vadd.f32 %v615_v32, %v468_v11  ;;  %1227 = vmatprep.mubr.msk.f32.mxu0 %vm470_vm1, %v668_v29  ;;  %v671_v36 = vmax.f32 %v621_v31, 0.0  ;;  %v1496_v31 = vand.u32 127, %v880_v20 }
 0x1a9   : > { %v1203_v34 = vpop.f32.mrf.mxu1  ;;  %1228 = vmatmul.mubr.msk.f32.gmra.mxu0 %vm470_vm1, %v669_v30 }
 0x1aa   : > { %v670_v35 = vmax.f32 %v616_v33, 0.0  ;;  %v631_v37 = vadd.f32 %v1203_v34, %v468_v11  ;;  %vm882_vm2 = vcmp.ge.s32.totalorder %v1496_v31, 8 }
 0x1ab   : > { %v625_v38 = vpop.f32.mrf.mxu1 }
 0x1ac   : > { %v626_v39 = vadd.f32 %v625_v38, %v468_v11  ;;  %1230 = vmatprep.mubr.msk.f32.mxu0 %vm470_vm1, %v670_v35  ;;  %v673_v42 = vmax.f32 %v631_v37, 0.0 }
 0x1ad   : > { %v1206_v40 = vpop.f32.mrf.mxu1  ;;  %1231 = vmatmul.mubr.msk.f32.gmra.mxu0 %vm470_vm1, %v671_v36 }
 0x1ae   : > { %v672_v41 = vmax.f32 %v626_v39, 0.0  ;;  %v641_v43 = vadd.f32 %v1206_v40, %v468_v11 }
 0x1af   : > { %v635_v44 = vpop.f32.mrf.mxu1 }
 0x1b0   : > { %v636_v45 = vadd.f32 %v635_v44, %v468_v11  ;;  %1233 = vmatprep.mubr.msk.f32.mxu0 %vm470_vm1, %v672_v41  ;;  %v675_v48 = vmax.f32 %v641_v43, 0.0 }
 0x1b1   : > { %v1209_v46 = vpop.f32.mrf.mxu1  ;;  %1234 = vmatmul.mubr.msk.f32.gmra.mxu0 %vm470_vm1, %v673_v42 }
 0x1b2   : > { %v674_v47 = vmax.f32 %v636_v45, 0.0  ;;  %v651_v49 = vadd.f32 %v1209_v46, %v468_v11 }
 0x1b3   : > { %v645_v50 = vpop.f32.mrf.mxu1 }
 0x1b4   : > { %v646_v51 = vadd.f32 %v645_v50, %v468_v11  ;;  %1236 = vmatprep.mubr.msk.f32.mxu0 %vm470_vm1, %v674_v47  ;;  %v677_v54 = vmax.f32 %v651_v49, 0.0 }
 0x1b5   : > { %v1212_v52 = vpop.f32.mrf.mxu1  ;;  %1237 = vmatmul.mubr.msk.f32.gmra.mxu0 %vm470_vm1, %v675_v48 }
 0x1b6   : > { %v676_v53 = vmax.f32 %v646_v51, 0.0  ;;  %v661_v55 = vadd.f32 %v1212_v52, %v468_v11 }
 0x1b7   : > { %v655_v56 = vpop.f32.mrf.mxu1 }
 0x1b8   : > { %v656_v57 = vadd.f32 %v655_v56, %v468_v11  ;;  %1239 = vmatprep.mubr.msk.f32.mxu0 %vm470_vm1, %v676_v53  ;;  %v679_v59 = vmax.f32 %v661_v55, 0.0 }
 0x1b9   : > { %1240 = vmatmul.mubr.msk.f32.gmra.mxu0 %vm470_vm1, %v677_v54 }
 0x1ba   : > { %v678_v58 = vmax.f32 %v656_v57, 0.0 }
 0x1bc   : > { %1242 = vmatprep.mubr.msk.f32.mxu0 %vm470_vm1, %v678_v58 }
 0x1bd   : > { %1243 = vmatmul.mubr.msk.f32.gmra.mxu0 %vm470_vm1, %v679_v59 }
 0x261   : > { %v1223_v61 = vpop.f32.mrf.mxu0 }
 0x262   : > { %v807_v62 = vadd.f32 %v1223_v61, %v1466_v60 }
 0x263   : > { %v801_v63 = vpop.f32.mrf.mxu0 }
 0x264   : > { %v884_v0 = vmax.f32 %v807_v62, -20.0  ;;  %v1470_v1 = vadd.f32 %v801_v63, %v1466_v60 }
 0x265   : > { %v1226_v2 = vpop.f32.mrf.mxu0 }
 0x266   : > { %v900_v3 = vmin.f32 %v884_v0, 2.0  ;;  %v883_v4 = vmax.f32 %v1470_v1, -20.0  ;;  %v1474_v5 = vadd.f32 %v1226_v2, %v1466_v60 }
 0x267   : > { %v811_v6 = vpop.f32.mrf.mxu0 }
 0x268   : > { %v917_v7 = vmul.f32 1.442695, %v900_v3  ;;  %v899_v8 = vmin.f32 %v883_v4, 2.0  ;;  %v886_v9 = vmax.f32 %v1474_v5, -20.0  ;;  %v1478_v10 = vadd.f32 %v811_v6, %v1466_v60 }
 0x269   : > { %v1229_v11 = vpop.f32.mrf.mxu0 }
 0x26a   : > { %1259 = vpow2.f32 %v917_v7  ;;  %v915_v12 = vmul.f32 1.442695, %v899_v8  ;;  %v902_v13 = vmin.f32 %v886_v9, 2.0  ;;  %v885_v14 = vmax.f32 %v1478_v10, -20.0 }
 0x26b   : > { %v1482_v15 = vadd.f32 %v1229_v11, %v1466_v60  ;;  %v821_v16 = vpop.f32.mrf.mxu0 }
 0x26c   : > { %1261 = vpow2.f32 %v915_v12  ;;  %v921_v17 = vmul.f32 1.442695, %v902_v13  ;;  %v901_v18 = vmin.f32 %v885_v14, 2.0  ;;  %v1485_v19 = vadd.f32 %v821_v16, %v1466_v60 }
 0x26d   : > { %v888_v21 = vmax.f32 %v1482_v15, -20.0  ;;  %v1232_v23 = vpop.f32.mrf.mxu0 }
 0x26e   : > { %1263 = vpow2.f32 %v921_v17  ;;  %v919_v24 = vmul.f32 1.442695, %v901_v18  ;;  %v887_v25 = vmax.f32 %v1485_v19, -20.0  ;;  %v1490_v26 = vadd.f32 %v1232_v23, %v1466_v60 }
 0x26f   : > { %v904_v22 = vmin.f32 %v888_v21, 2.0  ;;  %v831_v27 = vpop.f32.mrf.mxu0 }
 0x270   : > { %1265 = vpow2.f32 %v919_v24  ;;  %v903_v28 = vmin.f32 %v887_v25, 2.0  ;;  %v890_v29 = vmax.f32 %v1490_v26, -20.0  ;;  %v1494_v30 = vadd.f32 %v831_v27, %v1466_v60 }
 0x271   : > { %v925_v32 = vmul.f32 1.442695, %v904_v22  ;;  %v1235_v33 = vpop.f32.mrf.mxu0 }
 0x272   : > { %v923_v34 = vmul.f32 1.442695, %v903_v28  ;;  %v906_v35 = vmin.f32 %v890_v29, 2.0  ;;  %v889_v36 = vmax.f32 %v1494_v30, -20.0  ;;  %v1500_v37 = vadd.f32 %v1235_v33, %v1466_v60 }
 0x273   : > { %1267 = vpow2.f32 %v925_v32  ;;  %v841_v38 = vpop.f32.mrf.mxu0 }
 0x274   : > { %1269 = vpow2.f32 %v923_v34  ;;  %v929_v39 = vmul.f32 1.442695, %v906_v35  ;;  %v905_v40 = vmin.f32 %v889_v36, 2.0  ;;  %v892_v41 = vmax.f32 %v1500_v37, -20.0 }
 0x275   : > { %v1505_v42 = vadd.f32 %v841_v38, %v1466_v60  ;;  %v1238_v43 = vpop.f32.mrf.mxu0 }
 0x276   : > { %1271 = vpow2.f32 %v929_v39  ;;  %v927_v44 = vmul.f32 1.442695, %v905_v40  ;;  %v908_v45 = vmin.f32 %v892_v41, 2.0  ;;  %v1515_v46 = vadd.f32 %v1238_v43, %v1466_v60 }
 0x277   : > { %v1260_v47 = vpop.eup %1259  ;;  %v891_v48 = vmax.f32 %v1505_v42, -20.0  ;;  %v851_v49 = vpop.f32.mrf.mxu0 }
 0x278   : > { %v948_v50 = vsel %vm882_vm2, %v1260_v47, %v807_v62  ;;  %1273 = vpow2.f32 %v927_v44  ;;  %v933_v51 = vmul.f32 1.442695, %v908_v45  ;;  %v894_v52 = vmax.f32 %v1515_v46, -20.0 }
 0x279   : > { %v1262_v53 = vpop.eup %1261  ;;  %964 = vst.msk [vmem:[%s1512_s29 + $0x8] sm:$0xff] %vm253_vm0, %v948_v50  ;;  %v907_v54 = vmin.f32 %v891_v48, 2.0  ;;  %v1524_v55 = vadd.f32 %v851_v49, %v1466_v60  ;;  %v1241_v56 = vpop.f32.mrf.mxu0 }
 0x27a   : > { %v947_v57 = vsel %vm882_vm2, %v1262_v53, %v1470_v1  ;;  %1275 = vpow2.f32 %v933_v51  ;;  %v910_v58 = vmin.f32 %v894_v52, 2.0  ;;  %v1530_v59 = vadd.f32 %v1241_v56, %v1466_v60 }
 0x27b   : > { %v1264_v61 = vpop.eup %1263  ;;  %963 = vst.msk [vmem:[%s1512_s29] sm:$0xff] %vm253_vm0, %v947_v57  ;;  %v931_v62 = vmul.f32 1.442695, %v907_v54  ;;  %v893_v63 = vmax.f32 %v1524_v55, -20.0  ;;  %v861_v0 = vpop.f32.mrf.mxu0 }
 0x27c   : > { %v950_v2 = vsel %vm882_vm2, %v1264_v61, %v1474_v5  ;;  %v937_v3 = vmul.f32 1.442695, %v910_v58  ;;  %v896_v1 = vmax.f32 %v1530_v59, -20.0  ;;  %v862_v4 = vadd.f32 %v861_v0, %v1466_v60 }
 0x27d   : > { %v1266_v6 = vpop.eup %1265  ;;  %966 = vst.msk [vmem:[%s1512_s29 + $0x18] sm:$0xff] %vm253_vm0, %v950_v2  ;;  %1277 = vpow2.f32 %v931_v62  ;;  %v909_v7 = vmin.f32 %v893_v63, 2.0  ;;  %v1244_v8 = vpop.f32.mrf.mxu0 }
 0x27e   : > { %v949_v9 = vsel %vm882_vm2, %v1266_v6, %v1478_v10  ;;  %1279 = vpow2.f32 %v937_v3  ;;  %v912_v11 = vmin.f32 %v896_v1, 2.0  ;;  %v895_v12 = vmax.f32 %v862_v4, -20.0 }
 0x27f   : > { %965 = vst.msk [vmem:[%s1512_s29 + $0x10] sm:$0xff] %vm253_vm0, %v949_v9  ;;  %v935_v5 = vmul.f32 1.442695, %v909_v7  ;;  %v877_v13 = vadd.f32 %v1244_v8, %v1466_v60  ;;  %v871_v14 = vpop.f32.mrf.mxu0 }
 0x280   : > { %v1268_v16 = vpop.eup %1267  ;;  %v941_v17 = vmul.f32 1.442695, %v912_v11  ;;  %v911_v18 = vmin.f32 %v895_v12, 2.0  ;;  %v872_v20 = vadd.f32 %v871_v14, %v1466_v60 }
 0x281   : > { %v1270_v21 = vpop.eup %1269  ;;  %v952_v10 = vsel %vm882_vm2, %v1268_v16, %v1482_v15  ;;  %1281 = vpow2.f32 %v935_v5  ;;  %v898_v23 = vmax.f32 %v877_v13, -20.0 }
 0x282   : > { %968 = vst.msk [vmem:[%s1512_s29 + $0x28] sm:$0xff] %vm253_vm0, %v952_v10  ;;  %v951_v24 = vsel %vm882_vm2, %v1270_v21, %v1485_v19  ;;  %1283 = vpow2.f32 %v941_v17  ;;  %v939_v25 = vmul.f32 1.442695, %v911_v18  ;;  %v897_v22 = vmax.f32 %v872_v20, -20.0 }
 0x283   : > { %v1272_v27 = vpop.eup %1271  ;;  %967 = vst.msk [vmem:[%s1512_s29 + $0x20] sm:$0xff] %vm253_vm0, %v951_v24  ;;  %v914_v60 = vmin.f32 %v898_v23, 2.0 }
 0x284   : > { %v954_v15 = vsel %vm882_vm2, %v1272_v27, %v1490_v26  ;;  %1285 = vpow2.f32 %v939_v25  ;;  %v913_v28 = vmin.f32 %v897_v22, 2.0 }
 0x285   : > { %v1274_v29 = vpop.eup %1273  ;;  %970 = vst.msk [vmem:[%s1512_s29 + $0x38] sm:$0xff] %vm253_vm0, %v954_v15  ;;  %v945_v19 = vmul.f32 1.442695, %v914_v60 }
 0x286   : > { %v953_v32 = vsel %vm882_vm2, %v1274_v29, %v1494_v30  ;;  %v943_v33 = vmul.f32 1.442695, %v913_v28 }
 0x287   : > { %v1276_v34 = vpop.eup %1275  ;;  %969 = vst.msk [vmem:[%s1512_s29 + $0x30] sm:$0xff] %vm253_vm0, %v953_v32  ;;  %1287 = vpow2.f32 %v945_v19 }
 0x288   : > { %v956_v26 = vsel %vm882_vm2, %v1276_v34, %v1500_v37  ;;  %1289 = vpow2.f32 %v943_v33 }
 0x289   : > { %972 = vst.msk [vmem:[%s1512_s29 + $0x48] sm:$0xff] %vm253_vm0, %v956_v26 }
 0x28a   : > { %v1278_v35 = vpop.eup %1277 }
 0x28b   : > { %v1280_v36 = vpop.eup %1279  ;;  %v955_v30 = vsel %vm882_vm2, %v1278_v35, %v1505_v42 }
 0x28c   : > { %971 = vst.msk [vmem:[%s1512_s29 + $0x40] sm:$0xff] %vm253_vm0, %v955_v30  ;;  %v958_v38 = vsel %vm882_vm2, %v1280_v36, %v1515_v46 }
 0x28d   : > { %974 = vst.msk [vmem:[%s1512_s29 + $0x58] sm:$0xff] %vm253_vm0, %v958_v38 }
 0x28e   : > { %v1282_v37 = vpop.eup %1281 }
 0x28f   : > { %v1284_v39 = vpop.eup %1283  ;;  %v957_v40 = vsel %vm882_vm2, %v1282_v37, %v1524_v55 }
 0x290   : > { %973 = vst.msk [vmem:[%s1512_s29 + $0x50] sm:$0xff] %vm253_vm0, %v957_v40  ;;  %v960_v41 = vsel %vm882_vm2, %v1284_v39, %v1530_v59 }
 0x291   : > { %v1286_v42 = vpop.eup %1285  ;;  %976 = vst.msk [vmem:[%s1512_s29 + $0x68] sm:$0xff] %vm253_vm0, %v960_v41 }
 0x292   : > { %v959_v43 = vsel %vm882_vm2, %v1286_v42, %v862_v4 }
 0x293   : > { %975 = vst.msk [vmem:[%s1512_s29 + $0x60] sm:$0xff] %vm253_vm0, %v959_v43 }
 0x294   : > { %v1288_v44 = vpop.eup %1287 }
 0x295   : > { %v1290_v45 = vpop.eup %1289  ;;  %v962_v46 = vsel %vm882_vm2, %v1288_v44, %v877_v13 }
 0x296   : > { %978 = vst.msk [vmem:[%s1512_s29 + $0x78] sm:$0xff] %vm253_vm0, %v962_v46  ;;  %v961_v47 = vsel %vm882_vm2, %v1290_v45, %v872_v20 }
 0x297   : > { %977 = vst.msk [vmem:[%s1512_s29 + $0x70] sm:$0xff] %vm253_vm0, %v961_v47 }
 0x298 PF: > { %s15_s18 = sadd.s32 1, %s1297_s18  }
 0x299   : > { %p12_p4 = scmp.ge.s32.totalorder %s15_s18, 4  }
 0x29b   :  { %14 = sbr.rel (!%p12_p4) target bundleno = 1 (0x1), region = 70 }

</bundles_post_ra>
